<compile_context>
chip_gen: v6e
topology: v6e:2x2x1
jax: 0.10.0
libtpu: 0.0.40
codegen_flags: <defaults>
</compile_context>

<pallas_src>
import math

import jax
import jax.numpy as jnp
from jax.experimental import pallas as pl
from jax.experimental.pallas import tpu as pltpu


def translation_kernel(point_ref, trans_ref, sel_ref, out_ref):
    # point_ref: VMEM (TB, TL)  -- TB folded rows, TL lane-dense columns
    # trans_ref: VMEM (TB, KP)  -- per-row translations (fold*C values, 0-padded)
    # sel_ref  : VMEM (KP, TL)  -- constant 0/1 block-diagonal selector:
    #                              sel[g*C + c, g*P*C + p*C + c] = 1
    # out_ref  : VMEM (TB, TL)
    #
    # Expand trans per point via a tiny MXU matmul (selector is exactly 0/1;
    # f32 path validated exact to 1e-5 against the pure-JAX reference), then
    # one full-tile native-dtype add and one lane-dense, unmasked store.
    t_rep = jnp.dot(trans_ref[...], sel_ref[...],
                    preferred_element_type=jnp.float32)        # (TB, TL) f32
    out_ref[...] = point_ref[...] + t_rep.astype(out_ref.dtype)


def _num_tensorcores():
    """Best-effort TensorCore count of the local chip (perf heuristic only)."""
    try:
        kind = jax.devices()[0].device_kind.lower()
    except Exception:  # pragma: no cover - defensive; never a correctness issue
        return 1
    # v7x (2 TC) and megacore parts (v4 / v5p) can shard a "parallel" grid axis
    # across cores; v5e / v6e are single-TC.
    return 2 if any(tag in kind for tag in ("v7", "v5p", "v4")) else 1


def _choose_tiling(rows, lanes, itemsize, target_bytes, min_steps):
    """Pick (rows_per_block, lanes_per_block)."""
    # Lane tile: keep the full lane-dense row unless even 8 rows blow the
    # budget AND the row is 128-aligned (so partial lane blocks stay dense).
    if lanes % 128 == 0 and 8 * lanes * itemsize > target_bytes:
        tl = max(128, (target_bytes // (8 * itemsize)) // 128 * 128)
        tl = min(tl, lanes)
    else:
        tl = lanes
    lane_steps = -(-lanes // tl)

    # Row tile: as big as the budget allows (mem-bound add wants big blocks),
    # while keeping enough total grid steps for multi-TC sharding/pipelining.
    if rows <= 8:
        tb = rows                               # block dim == full dim -> legal
    else:
        tb = max(8, target_bytes // (tl * itemsize))
        need_row_steps = -(-min_steps // lane_steps)
        if need_row_steps > 1:
            tb = min(tb, max(8, rows // need_row_steps))
        if tb >= rows:
            tb = rows                           # full dim -> legal
        else:
            tb = max(8, (tb // 8) * 8)          # second-to-last dim: multiple of 8
    return int(tb), int(tl)


def translation_forward(point, trans, *,
                        target_block_bytes=2 * 1024 * 1024,
                        vmem_limit_bytes=32 * 1024 * 1024):
    """point: (B, NP, P, C), trans: (B, NP, C) -> point + trans[:, :, None, :]."""
    B, NPRIM, P, C = point.shape
    assert trans.shape == (B, NPRIM, C), trans.shape

    dtype = point.dtype
    itemsize = jnp.dtype(dtype).itemsize
    BN = B * NPRIM
    PC = P * C

    # ---- lane densification: fold primitives so the lane dim is 128-aligned ----
    g_needed = 128 // math.gcd(PC, 128)         # power of two
    fold = math.gcd(BN, g_needed)               # divisor of BN -> pure merge reshape
    while fold > 1 and BN // fold < 8:          # keep >=8 rows for the MXU when possible
        fold //= 2
    rows = BN // fold
    L = fold * PC                               # lanes per folded row
    K = fold * C                                # matmul contraction dim
    KP = -(-K // 8) * 8                         # pad K to a sublane multiple

    # Only dimension-merging reshapes of the big tensor -- no transposes.
    point2d = point.reshape(rows, L)
    trans2d = trans.reshape(rows, K)
    if KP != K:
        trans2d = jnp.pad(trans2d, ((0, 0), (0, KP - K)))

    # 0/1 block-diagonal selector: sel[g*C + c, g*PC + p*C + c] = 1.
    sel_dtype = jnp.float32 if dtype == jnp.float32 else dtype
    sel = jnp.kron(jnp.eye(fold, dtype=sel_dtype),
                   jnp.tile(jnp.eye(C, dtype=sel_dtype), (1, P)))      # (K, L)
    if KP != K:
        sel = jnp.pad(sel, ((0, KP - K), (0, 0)))                      # (KP, L)

    # ---- tiling ----
    ncores = _num_tensorcores()
    min_steps = 1 if ncores == 1 else 4 * ncores
    tb, tl = _choose_tiling(rows, L, itemsize, target_block_bytes, min_steps)
    row_steps = pl.cdiv(rows, tb)
    lane_steps = pl.cdiv(L, tl)

    # Grid ordered (lane, row): the selector's block index only depends on the
    # outer lane axis, so it is not re-fetched across the inner row loop.
    grid = (lane_steps, row_steps)

    flops = int(rows * L + 2 * rows * KP * L)
    bytes_accessed = int((2 * rows * L + rows * KP) * itemsize
                         + KP * L * jnp.dtype(sel_dtype).itemsize)
    cost = pl.CostEstimate(flops=flops, transcendentals=0,
                           bytes_accessed=bytes_accessed)

    out2d = pl.pallas_call(
        translation_kernel,
        out_shape=jax.ShapeDtypeStruct((rows, L), dtype),
        grid_spec=pltpu.PrefetchScalarGridSpec(
            num_scalar_prefetch=0,
            grid=grid,
            in_specs=[
                pl.BlockSpec((tb, tl), lambda j, i: (i, j)),   # point block
                pl.BlockSpec((tb, KP), lambda j, i: (i, 0)),   # trans block
                pl.BlockSpec((KP, tl), lambda j, i: (0, j)),   # constant selector
            ],
            out_specs=pl.BlockSpec((tb, tl), lambda j, i: (i, j)),
        ),
        compiler_params=pltpu.CompilerParams(
            dimension_semantics=("parallel", "parallel"),
            vmem_limit_bytes=vmem_limit_bytes),
        cost_estimate=cost,
    )(point2d, trans2d, sel)

    return out2d.reshape(B, NPRIM, P, C)


def translation_reference(point, trans):
    """Pure-JAX reference of the PyTorch module."""
    return point + trans[:, :, None, :]


if __name__ == "__main__":
    key = jax.random.PRNGKey(0)
    k1, k2, k3, k4 = jax.random.split(key, 4)

    # Test 1: module-consistent small shapes (batch=2, np=4, 16 points, 3 coords).
    B, NPRIM, P, C = 2, 4, 16, 3
    point = jax.random.normal(k1, (B, NPRIM, P, C), dtype=jnp.float32)
    trans = jax.random.normal(k2, (B, NPRIM, C), dtype=jnp.float32)
    out = jax.block_until_ready(translation_forward(point, trans))
    ref = translation_reference(point, trans)
    assert out.shape == (B, NPRIM, P, C), out.shape
    assert jnp.allclose(out, ref, atol=1e-5, rtol=1e-5), \
        float(jnp.max(jnp.abs(out - ref)))

    # Test 2: exercises lane-folding (fold=8 -> 384-lane rows), a multi-step
    # grid and a ragged last row-block (13 rows, tb=8 -> partial block of 5).
    B2, NP2 = 2, 52                              # BN = 104 -> fold = 8 -> rows = 13
    point2 = jax.random.normal(k3, (B2, NP2, P, C), dtype=jnp.float32)
    trans2 = jax.random.normal(k4, (B2, NP2, C), dtype=jnp.float32)
    out2 = jax.block_until_ready(
        translation_forward(point2, trans2, target_block_bytes=8 * 384 * 4))
    ref2 = translation_reference(point2, trans2)
    assert jnp.allclose(out2, ref2, atol=1e-5, rtol=1e-5), \
        float(jnp.max(jnp.abs(out2 - ref2)))

    # Test 3: bf16 native-dtype path (no f32 round-trip of the point tile).
    pbf = point.astype(jnp.bfloat16)
    tbf = trans.astype(jnp.bfloat16)
    out3 = jax.block_until_ready(translation_forward(pbf, tbf))
    ref3 = translation_reference(pbf, tbf)
    assert jnp.allclose(out3.astype(jnp.float32), ref3.astype(jnp.float32),
                        atol=2e-2, rtol=2e-2)

    print("KERNEL_OK")
</pallas_src>

<mosaic_0001>
module attributes {stable_mosaic.version = 11 : i64} {
  func.func @translation_kernel(%arg0: i32, %arg1: i32, %arg2: memref<8x48xf32, #tpu.memory_space<vmem>>, %arg3: memref<8x8xf32, #tpu.memory_space<vmem>>, %arg4: memref<8x48xf32, #tpu.memory_space<vmem>>, %arg5: memref<8x48xf32, #tpu.memory_space<vmem>>) attributes {dimension_semantics = [#tpu.dimension_semantics<parallel>, #tpu.dimension_semantics<parallel>], iteration_bounds = array<i64: 1, 1>, scalar_prefetch = 0 : i64, scratch_operands = 0 : i64, tpu.core_type = #tpu.core_type<tc>, window_params = [{transform_indices = @transform_0, window_bounds = array<i64: 8, 48>}, {transform_indices = @transform_1, window_bounds = array<i64: 8, 8>}, {transform_indices = @transform_2, window_bounds = array<i64: 8, 48>}, {transform_indices = @transform_3, window_bounds = array<i64: 8, 48>}]} {
    %c0 = arith.constant 0 : index
    %c0_0 = arith.constant 0 : index
    %0 = vector.load %arg3[%c0, %c0_0] : memref<8x8xf32, #tpu.memory_space<vmem>>, vector<8x8xf32>
    %c0_1 = arith.constant 0 : index
    %c0_2 = arith.constant 0 : index
    %1 = vector.load %arg4[%c0_1, %c0_2] : memref<8x48xf32, #tpu.memory_space<vmem>>, vector<8x48xf32>
    %cst = arith.constant dense<0.000000e+00> : vector<8x48xf32>
    %2 = tpu.matmul %0, %1, %cst {dimension_numbers = #tpu.dot_dimension_numbers<[1], [0], [0], [1], [0, 0, 1, 1], [], []>} : vector<8x8xf32>, vector<8x48xf32>, vector<8x48xf32> -> vector<8x48xf32>
    %c0_3 = arith.constant 0 : index
    %c0_4 = arith.constant 0 : index
    %3 = vector.load %arg2[%c0_3, %c0_4] : memref<8x48xf32, #tpu.memory_space<vmem>>, vector<8x48xf32>
    %4 = arith.addf %3, %2 : vector<8x48xf32>
    %c0_5 = arith.constant 0 : index
    %c0_6 = arith.constant 0 : index
    %5 = vector.load %arg5[%c0_5, %c0_6] : memref<8x48xf32, #tpu.memory_space<vmem>>, vector<8x48xf32>
    tpu.vector_store %arg5[%c0_5, %c0_6], %4 {strides = array<i32>} : memref<8x48xf32, #tpu.memory_space<vmem>>, vector<8x48xf32>,
    return
  }
  func.func @transform_0(%arg0: i32, %arg1: i32) -> (i32, i32) {
    %c0_i32 = arith.constant 0 : i32
    return %arg1, %arg0 : i32, i32
  }
  func.func @transform_1(%arg0: i32, %arg1: i32) -> (i32, i32) {
    %c0_i32 = arith.constant 0 : i32
    %c0_i32_0 = arith.constant 0 : i32
    return %arg1, %c0_i32 : i32, i32
  }
  func.func @transform_2(%arg0: i32, %arg1: i32) -> (i32, i32) {
    %c0_i32 = arith.constant 0 : i32
    %c0_i32_0 = arith.constant 0 : i32
    return %c0_i32, %arg0 : i32, i32
  }
  func.func @transform_3(%arg0: i32, %arg1: i32) -> (i32, i32) {
    %c0_i32 = arith.constant 0 : i32
    return %arg1, %arg0 : i32, i32
  }
}

</mosaic_0001>

<bundles_post_ra>
// kernel: tpu_custom_call.1
= control target key start
LH: loop header
LB: loop body
LE: loop exit
PB: predicated region body
PF: predicated region fallthrough
CT: control target
= control target key end

     0   :  { %8 = vsyncpa [#allocation3], 0  ;;  %s284_s0 = inlined_call_operand.hbm [shape: f32[8,48], index: 0, kind: input, shape index: {}]   ;;  %s285_s1 = inlined_call_operand.hbm [shape: f32[8,8], index: 1, kind: input, shape index: {}]   ;;  %s286_s2 = inlined_call_operand.hbm [shape: f32[8,48], index: 2, kind: input, shape index: {}]   ;;  %s287_s3 = inlined_call_operand.hbm [shape: f32[8,48], index: 3, kind: output, shape index: {}]  }
   0x1   :  { %9 = vsyncpa [#allocation6], 0 }
   0x2   :  { %10 = vsyncpa [#allocation4], 0  ;;  %s246_s12 = smov [#allocation5]   ;;  %s247_s14 = smov [#allocation2]  }
   0x3   :  { %s27_s13 = sshll.u32 %s246_s12, 4  ;;  %s17_s15 = sshll.u32 %s247_s14, 4  ;;  %s28_s13 = int_to_ptr.vmem [resolvable:$true] %s27_s13  ;;  %s18_s15 = int_to_ptr.vmem [resolvable:$true] %s17_s15 }
   0x4   :  { %s168_s16 = scalar_lea.vmem %s28_s13, 128  ;;  %p173_p1 = scmp.lt.s32.totalorder %s28_s13, %s28_s13 }
   0x5   :  { %p169_p0 = scmp.ne.s32.totalorder %s28_s13, %s168_s16  ;;  %p174_p2 = scmp.lt.s32.totalorder %s168_s16, %s168_s16 }
   0x7   :  { %p175_p3 = por %p174_p2, %p173_p1 }
   0x9   :  { %p176_p4 = pnand %p175_p3, %p169_p0 }
   0xb   :  { %179 = shalt.err (!%p176_p4)
}
   0xc   :  { %30 = dma.hbm_to_vmem [thread:$0]  %s285_s1, 128, %s28_s13, [#allocation6]  }
   0xd   :  { %s188_s19 = scalar_lea.vmem %s18_s15, 128  ;;  %p193_p6 = scmp.lt.s32.totalorder %s18_s15, %s18_s15 }
   0xe   :  { %p189_p5 = scmp.ne.s32.totalorder %s18_s15, %s188_s19  ;;  %p194_p7 = scmp.lt.s32.totalorder %s188_s19, %s188_s19 }
  0x10   :  { %p195_p8 = por %p194_p7, %p193_p6 }
  0x12   :  { %p196_p9 = pnand %p195_p8, %p189_p5 }
  0x14   :  { %199 = shalt.err (!%p196_p9)
}
  0x15   :  { %20 = dma.hbm_to_vmem [thread:$0]  %s284_s0, 128, %s18_s15, [#allocation3]  }
  0x16   :  { %s248_s22 = smov [#allocation7]  }
  0x17   :  { %s37_s23 = sshll.u32 %s248_s22, 4  ;;  %s38_s23 = int_to_ptr.vmem [resolvable:$true] %s37_s23 }
  0x18   :  { %s208_s24 = scalar_lea.vmem %s38_s23, 128  ;;  %p213_p11 = scmp.lt.s32.totalorder %s38_s23, %s38_s23 }
  0x19   :  { %p209_p10 = scmp.ne.s32.totalorder %s38_s23, %s208_s24  ;;  %p214_p12 = scmp.lt.s32.totalorder %s208_s24, %s208_s24 }
  0x1b   :  { %p215_p13 = por %p214_p12, %p213_p11 }
  0x1d   :  { %p216_p0 = pnand %p215_p13, %p209_p10 }
  0x1f   :  { %219 = shalt.err (!%p216_p0)
}
  0x20   :  { %40 = dma.hbm_to_vmem [thread:$0]  %s286_s2, 128, %s38_s23, [#allocation6]  }
  0x21   :  { %240 = dma.done.wait [#allocation3], 128  }
  0x22   :  { %241 = vsyncadd [#allocation3], 4294967168 }
  0x23   :  { %242 = dma.done.wait [#allocation6], 256  }
  0x24   :  { %243 = vsyncadd [#allocation6], 4294967040  ;;  %v249_v0 = vmov 0.0   ;;  %vm250_vm0 = vmmov 0   ;;  %vm52_vm1 = vcmask 64512   ;;  %v51_v1 = vld [vmem:[#allocation7] sm:$0xff] }
  0x25   :  { %149 = vmatprep.subr.mxu0 %v249_v0  ;;  %151 = vmatprep.mubr.msk.f32.mxu0 %vm250_vm0, %v249_v0  ;;  %v50_v2 = vld [vmem:[#allocation5] sm:$0xff]  ;;  %v126_v3 = vld [vmem:[#allocation2] sm:$0xff]  ;;  %s251_s0 = smov [#allocation8]   ;;  %vm128_vm2 = vcmask 392192  }
  0x26   :  { %150 = vmatpush3.msra.mxu0 %v51_v1  ;;  %s136_s26 = sshll.u32 %s251_s0, 4  ;;  %s137_s26 = int_to_ptr.vmem [resolvable:$true] %s136_s26 }
  0x27   :  { %152 = vmatmul.mubr.msk.f32.vlgmr.msra.gmra.mxu0 %vm52_vm1, %v50_v2  ;;  %s220_s2 = scalar_lea.vmem %s137_s26, 128  ;;  %p225_p2 = scmp.lt.s32.totalorder %s137_s26, %s137_s26 }
  0x28   :  { %p221_p1 = scmp.ne.s32.totalorder %s137_s26, %s220_s2  ;;  %p226_p3 = scmp.lt.s32.totalorder %s220_s2, %s220_s2 }
  0x2a   :  { %p227_p4 = por %p226_p3, %p225_p2 }
  0x2c   :  { %p228_p5 = pnand %p227_p4, %p221_p1 }
  0xe7   :  { %v122_v4 = vpop.f32.mrf.mxu0 }
  0xe8   :  { %v127_v5 = vadd.f32 %v126_v3, %v122_v4 }
  0xe9   :  { %v153_v6 = vpop.f32.mrf.mxu0 }
  0xea   :  { %129 = vst.msk [vmem:[#allocation8] sm:$0xff] %vm128_vm2, %v127_v5 }
  0xeb   :  { %231 = shalt.err (!%p228_p5)
}
  0xec   :  { %139 = dma.vmem_to_hbm [thread:$0]  %s137_s26, 128, %s287_s3, [#allocation4]  }
  0xed   :  { %244 = dma.done.wait [#allocation4], 128  }
  0xee   :  { %245 = vsyncadd [#allocation4], 4294967168 }
  0xef   :  { %143 = vsyncpa [#allocation3], 1 }
  0xf0   :  { %144 = vsyncpa [#allocation6], 1 }
  0xf1   :  { %145 = vsyncpa [#allocation4], 1 }

</bundles_post_ra>
